<compile_context>
chip_gen: v7x
topology: tpu7x:2x2x1
jax: 0.10.0
libtpu: 0.0.40
codegen_flags: <defaults>
</compile_context>

<pallas_src>
import math
from functools import partial

import jax
import jax.numpy as jnp
from jax.experimental import pallas as pl
from jax.experimental.pallas import tpu as pltpu


# ---------------------------------------------------------------------------
# Kernels
# ---------------------------------------------------------------------------
def webnet_kernel_ih(i_ref, h_ref, wi_ref, wh_ref, b_ref, out_ref):
    """new = i @ W_i + h @ W_h + b   (lane-dense, segment-aligned output)."""
    acc = jnp.dot(i_ref[...], wi_ref[...], preferred_element_type=jnp.float32)
    acc = acc + jnp.dot(h_ref[...], wh_ref[...],
                        preferred_element_type=jnp.float32)
    out_ref[...] = (acc + b_ref[...]).astype(out_ref.dtype)


def webnet_kernel_h(h_ref, wh_ref, b_ref, out_ref):
    """i=None branch: new = h @ W_h + b."""
    acc = jnp.dot(h_ref[...], wh_ref[...], preferred_element_type=jnp.float32)
    out_ref[...] = (acc + b_ref[...]).astype(out_ref.dtype)


def _round_up(n, m):
    return ((n + m - 1) // m) * m


# ---------------------------------------------------------------------------
# Jitted forward paths (pallas_call + output slices in one executable)
# ---------------------------------------------------------------------------
@partial(jax.jit, static_argnames=("n_hidden", "n_output", "h_pad"))
def _forward_ih(i, h, w_i, w_h, b, *, n_hidden, n_output, h_pad):
    batch, n_in = i.shape
    n_hid = h.shape[1]
    n_pad = w_i.shape[1]

    # Batch tiling: full block at small batch; 128-row tiles + parallel grid
    # (splits across the two TensorCores on v7x) at large batch.
    block_m = batch if batch <= 128 else 128
    grid_m = pl.cdiv(batch, block_m)

    out = pl.pallas_call(
        webnet_kernel_ih,
        out_shape=jax.ShapeDtypeStruct((batch, n_pad), jnp.float32),
        grid=(grid_m,),
        in_specs=[
            pl.BlockSpec((block_m, n_in), lambda m: (m, 0)),    # i
            pl.BlockSpec((block_m, n_hid), lambda m: (m, 0)),   # h
            pl.BlockSpec((n_in, n_pad), lambda m: (0, 0)),      # W_i (resident)
            pl.BlockSpec((n_hid, n_pad), lambda m: (0, 0)),     # W_h (resident)
            pl.BlockSpec((1, n_pad), lambda m: (0, 0)),         # bias (resident)
        ],
        out_specs=pl.BlockSpec((block_m, n_pad), lambda m: (m, 0)),
        compiler_params=pltpu.CompilerParams(
            dimension_semantics=("parallel",)),
    )(i, h, w_i, w_h, b)

    # Segment-aligned layout: h segment at lane 0, o segment at lane h_pad
    # (a 128-lane tile boundary) -> both slices are straight copies.
    return out[:, :n_hidden], out[:, h_pad:h_pad + n_output]


@partial(jax.jit, static_argnames=("n_hidden", "n_output", "h_pad"))
def _forward_h(h, w_h, b, *, n_hidden, n_output, h_pad):
    batch, n_hid = h.shape
    n_pad = w_h.shape[1]

    block_m = batch if batch <= 128 else 128
    grid_m = pl.cdiv(batch, block_m)

    out = pl.pallas_call(
        webnet_kernel_h,
        out_shape=jax.ShapeDtypeStruct((batch, n_pad), jnp.float32),
        grid=(grid_m,),
        in_specs=[
            pl.BlockSpec((block_m, n_hid), lambda m: (m, 0)),   # h
            pl.BlockSpec((n_hid, n_pad), lambda m: (0, 0)),     # W_h (resident)
            pl.BlockSpec((1, n_pad), lambda m: (0, 0)),         # bias (resident)
        ],
        out_specs=pl.BlockSpec((block_m, n_pad), lambda m: (m, 0)),
        compiler_params=pltpu.CompilerParams(
            dimension_semantics=("parallel",)),
    )(h, w_h, b)

    return out[:, :n_hidden], out[:, h_pad:h_pad + n_output]


def webnet_forward(i, h, params, o=None):
    """WebNet.forward(i, h, o) with default update_fn / aggregate_fn.

    Returns (new_h, new_o).  `o` is unused because the default
    update_fn(v, inv) = inv ignores the previous value.
    """
    kw = dict(n_hidden=params["n_hidden"], n_output=params["n_output"],
              h_pad=params["h_pad"])
    if i is None:
        return _forward_h(h, params["w_h_cat"], params["b_h"], **kw)
    return _forward_ih(i, h, params["w_i_cat"], params["w_h_cat"],
                       params["b_full"], **kw)


# ---------------------------------------------------------------------------
# Parameter construction (matches nn.Linear init; normalize_weights is a no-op)
# ---------------------------------------------------------------------------
def init_linear(key, fan_in, fan_out):
    """nn.Linear-style U(-1/sqrt(fan_in), 1/sqrt(fan_in)); weight stored
    pre-transposed as (fan_in, fan_out)."""
    kw, kb = jax.random.split(key)
    bound = 1.0 / math.sqrt(fan_in)
    w = jax.random.uniform(kw, (fan_in, fan_out), jnp.float32, -bound, bound)
    b = jax.random.uniform(kb, (1, fan_out), jnp.float32, -bound, bound)
    return w, b


def make_webnet_params(key, n_input, n_hidden, n_output):
    k1, k2, k3, k4 = jax.random.split(key, 4)
    w_ih, b_ih = init_linear(k1, n_input, n_hidden)
    w_hh, b_hh = init_linear(k2, n_hidden, n_hidden)
    w_io, b_io = init_linear(k3, n_input, n_output)
    w_ho, b_ho = init_linear(k4, n_hidden, n_output)
    # normalize_weights() in the reference module is a no-op.

    # Segment-aligned, lane-dense output layout: [h | pad][o | pad],
    # each segment padded to a multiple of 128 lanes.
    h_pad = _round_up(n_hidden, 128)
    o_pad = _round_up(n_output, 128)
    n_pad = h_pad + o_pad

    def place(to_h, to_o):
        rows = to_h.shape[0]
        out = jnp.zeros((rows, n_pad), jnp.float32)
        out = out.at[:, :n_hidden].set(to_h)
        out = out.at[:, h_pad:h_pad + n_output].set(to_o)
        return out

    w_i_cat = place(w_ih, w_io)                 # (n_input,  n_pad)
    w_h_cat = place(w_hh, w_ho)                 # (n_hidden, n_pad), shared by both paths
    # Pre-summed biases: ONLY valid for the default aggregate_fn (fromi+fromh)
    # and update_fn (identity on the aggregate).
    b_full = place(b_ih + b_hh, b_io + b_ho)    # (1, n_pad)  -- i provided
    b_h = place(b_hh, b_ho)                     # (1, n_pad)  -- i is None

    return dict(
        # fused / padded params used by the kernels
        w_i_cat=w_i_cat, w_h_cat=w_h_cat, b_full=b_full, b_h=b_h,
        n_input=n_input, n_hidden=n_hidden, n_output=n_output,
        h_pad=h_pad, n_pad=n_pad,
        # raw params kept only for the pure-JAX reference check
        w_ih=w_ih, b_ih=b_ih, w_hh=w_hh, b_hh=b_hh,
        w_io=w_io, b_io=b_io, w_ho=w_ho, b_ho=b_ho,
    )


# ---------------------------------------------------------------------------
# Pure-JAX reference (unfused, matches the PyTorch module op-for-op)
# ---------------------------------------------------------------------------
def webnet_reference(i, h, p):
    if i is None:
        inh = h @ p["w_hh"] + p["b_hh"]
        ino = h @ p["w_ho"] + p["b_ho"]
    else:
        inh = i @ p["w_ih"] + p["b_ih"] + h @ p["w_hh"] + p["b_hh"]
        ino = i @ p["w_io"] + p["b_io"] + h @ p["w_ho"] + p["b_ho"]
    return inh, ino


if __name__ == "__main__":
    n_input, n_hidden, n_output = 8, 32, 16
    batch = 2

    key = jax.random.PRNGKey(0)
    k_params, k_i, k_h = jax.random.split(key, 3)

    params = make_webnet_params(k_params, n_input, n_hidden, n_output)
    i = jax.random.normal(k_i, (batch, n_input), jnp.float32)
    h = jax.random.normal(k_h, (batch, n_hidden), jnp.float32)

    # Main path: i provided.
    new_h, new_o = webnet_forward(i, h, params)
    jax.block_until_ready((new_h, new_o))

    ref_h, ref_o = webnet_reference(i, h, params)
    assert new_h.shape == (batch, n_hidden)
    assert new_o.shape == (batch, n_output)
    assert jnp.allclose(new_h, ref_h, atol=1e-5, rtol=1e-5)
    assert jnp.allclose(new_o, ref_o, atol=1e-5, rtol=1e-5)

    # i=None path (module's other branch).
    nh2, no2 = webnet_forward(None, h, params)
    jax.block_until_ready((nh2, no2))
    rh2, ro2 = webnet_reference(None, h, params)
    assert jnp.allclose(nh2, rh2, atol=1e-5, rtol=1e-5)
    assert jnp.allclose(no2, ro2, atol=1e-5, rtol=1e-5)

    print("KERNEL_OK")
</pallas_src>

<mosaic_0001>
module attributes {stable_mosaic.version = 11 : i64} {
  func.func @webnet_kernel_ih(%arg0: i32, %arg1: memref<2x8xf32, #tpu.memory_space<vmem>>, %arg2: memref<2x32xf32, #tpu.memory_space<vmem>>, %arg3: memref<8x256xf32, #tpu.memory_space<vmem>>, %arg4: memref<32x256xf32, #tpu.memory_space<vmem>>, %arg5: memref<1x256xf32, #tpu.memory_space<vmem>>, %arg6: memref<2x256xf32, #tpu.memory_space<vmem>>) attributes {dimension_semantics = [#tpu.dimension_semantics<parallel>], iteration_bounds = array<i64: 1>, scalar_prefetch = 0 : i64, scratch_operands = 0 : i64, tpu.core_type = #tpu.core_type<tc>, window_params = [{transform_indices = @transform_0, window_bounds = array<i64: 2, 8>}, {transform_indices = @transform_1, window_bounds = array<i64: 2, 32>}, {pipeline_mode = #tpu.pipeline_mode<synchronous>, transform_indices = @transform_2, window_bounds = array<i64: 8, 256>}, {pipeline_mode = #tpu.pipeline_mode<synchronous>, transform_indices = @transform_3, window_bounds = array<i64: 32, 256>}, {pipeline_mode = #tpu.pipeline_mode<synchronous>, transform_indices = @transform_4, window_bounds = array<i64: 1, 256>}, {transform_indices = @transform_5, window_bounds = array<i64: 2, 256>}]} {
    %c0 = arith.constant 0 : index
    %c0_0 = arith.constant 0 : index
    %0 = vector.load %arg1[%c0, %c0_0] : memref<2x8xf32, #tpu.memory_space<vmem>>, vector<2x8xf32>
    %c0_1 = arith.constant 0 : index
    %c0_2 = arith.constant 0 : index
    %1 = vector.load %arg3[%c0_1, %c0_2] : memref<8x256xf32, #tpu.memory_space<vmem>>, vector<8x256xf32>
    %cst = arith.constant dense<0.000000e+00> : vector<2x256xf32>
    %2 = tpu.matmul %0, %1, %cst {dimension_numbers = #tpu.dot_dimension_numbers<[1], [0], [0], [1], [0, 0, 1, 1], [], []>} : vector<2x8xf32>, vector<8x256xf32>, vector<2x256xf32> -> vector<2x256xf32>
    %c0_3 = arith.constant 0 : index
    %c0_4 = arith.constant 0 : index
    %3 = vector.load %arg2[%c0_3, %c0_4] : memref<2x32xf32, #tpu.memory_space<vmem>>, vector<2x32xf32>
    %c0_5 = arith.constant 0 : index
    %c0_6 = arith.constant 0 : index
    %4 = vector.load %arg4[%c0_5, %c0_6] : memref<32x256xf32, #tpu.memory_space<vmem>>, vector<32x256xf32>
    %cst_7 = arith.constant dense<0.000000e+00> : vector<2x256xf32>
    %5 = tpu.matmul %3, %4, %cst_7 {dimension_numbers = #tpu.dot_dimension_numbers<[1], [0], [0], [1], [0, 0, 1, 1], [], []>} : vector<2x32xf32>, vector<32x256xf32>, vector<2x256xf32> -> vector<2x256xf32>
    %6 = arith.addf %2, %5 : vector<2x256xf32>
    %c0_8 = arith.constant 0 : index
    %c0_9 = arith.constant 0 : index
    %7 = vector.load %arg5[%c0_8, %c0_9] : memref<1x256xf32, #tpu.memory_space<vmem>>, vector<1x256xf32>
    %8 = vector.broadcast %7 : vector<1x256xf32> to vector<2x256xf32>
    %9 = arith.addf %6, %8 : vector<2x256xf32>
    %c0_10 = arith.constant 0 : index
    %c0_11 = arith.constant 0 : index
    %10 = vector.load %arg6[%c0_10, %c0_11] : memref<2x256xf32, #tpu.memory_space<vmem>>, vector<2x256xf32>
    tpu.vector_store %arg6[%c0_10, %c0_11], %9 {strides = array<i32>} : memref<2x256xf32, #tpu.memory_space<vmem>>, vector<2x256xf32>,
    return
  }
  func.func @transform_0(%arg0: i32) -> (i32, i32) {
    %c0_i32 = arith.constant 0 : i32
    %c0_i32_0 = arith.constant 0 : i32
    return %arg0, %c0_i32 : i32, i32
  }
  func.func @transform_1(%arg0: i32) -> (i32, i32) {
    %c0_i32 = arith.constant 0 : i32
    %c0_i32_0 = arith.constant 0 : i32
    return %arg0, %c0_i32 : i32, i32
  }
  func.func @transform_2(%arg0: i32) -> (i32, i32) {
    %c0_i32 = arith.constant 0 : i32
    %c0_i32_0 = arith.constant 0 : i32
    %c0_i32_1 = arith.constant 0 : i32
    return %c0_i32, %c0_i32_0 : i32, i32
  }
  func.func @transform_3(%arg0: i32) -> (i32, i32) {
    %c0_i32 = arith.constant 0 : i32
    %c0_i32_0 = arith.constant 0 : i32
    %c0_i32_1 = arith.constant 0 : i32
    return %c0_i32, %c0_i32_0 : i32, i32
  }
  func.func @transform_4(%arg0: i32) -> (i32, i32) {
    %c0_i32 = arith.constant 0 : i32
    %c0_i32_0 = arith.constant 0 : i32
    %c0_i32_1 = arith.constant 0 : i32
    return %c0_i32, %c0_i32_0 : i32, i32
  }
  func.func @transform_5(%arg0: i32) -> (i32, i32) {
    %c0_i32 = arith.constant 0 : i32
    %c0_i32_0 = arith.constant 0 : i32
    return %arg0, %c0_i32 : i32, i32
  }
}

</mosaic_0001>

<bundles_post_ra>
// kernel: _forward_ih.1
= control target key start
LH: loop header
LB: loop body
LE: loop exit
PB: predicated region body
PF: predicated region fallthrough
CT: control target
= control target key end

     0   :  { %10 = vsyncpa [#allocation3], 0  ;;  %s421_s0 = inlined_call_operand.hbm [shape: f32[2,8], index: 0, kind: input, shape index: {}]   ;;  %s422_s1 = inlined_call_operand.vmem [shape: f32[2,32], index: 1, kind: input, shape index: {}]   ;;  %s423_s2 = inlined_call_operand.hbm [shape: f32[8,256], index: 2, kind: input, shape index: {}]   ;;  %s424_s3 = inlined_call_operand.hbm [shape: f32[32,256], index: 3, kind: input, shape index: {}]   ;;  %s425_s4 = inlined_call_operand.vmem [shape: f32[1,256], index: 4, kind: input, shape index: {}]   ;;  %s426_s5 = inlined_call_operand.vmem [shape: f32[2,256], index: 5, kind: output, shape index: {}]  }
   0x1   :  { %11 = vsyncpa [#allocation5], 0  ;;  %s340_s18 = smov [#allocation4]   ;;  %s341_s20 = smov [#allocation2]  }
   0x2   :  { %s30_s19 = sshll.u32 %s340_s18, 4  ;;  %s18_s21 = sshll.u32 %s341_s20, 4  ;;  %s31_s19 = int_to_ptr.vmem [resolvable:$true] %s30_s19  ;;  %s19_s21 = int_to_ptr.vmem [resolvable:$true] %s18_s21 }
   0x3   :  { %s270_s24 = scalar_lea.hbm %s423_s2, 256 }
   0x4   :  { %p271_p0 = scmp.ne.s32.totalorder %s423_s2, %s270_s24  ;;  %p274_p1 = scmp.lt.u32.totalorder %s270_s24, %s423_s2 }
   0x6   :  { %p276_p2 = pnand %p274_p1, %p271_p0 }
   0x8   :  { %279 = shalt.err (!%p276_p2)
}
   0x9   :  { %s280_s29 = scalar_lea.vmem %s31_s19, 256  ;;  %p285_p4 = scmp.lt.s32.totalorder %s31_s19, %s31_s19 }
   0xa   :  { %p281_p3 = scmp.ne.s32.totalorder %s31_s19, %s280_s29  ;;  %p286_p5 = scmp.lt.s32.totalorder %s280_s29, %s280_s29 }
   0xc   :  { %p287_p6 = por %p286_p5, %p285_p4 }
   0xe   :  { %p288_p7 = pnand %p287_p6, %p281_p3 }
  0x10   :  { %291 = shalt.err (!%p288_p7)
}
  0x11   :  { %33 = dma.hbm_to_vmem [thread:$0]  %s423_s2, 256, %s31_s19, [#allocation5]  }
  0x12   :  { %s292_s9 = scalar_lea.hbm %s421_s0, 32 }
  0x13   :  { %p293_p8 = scmp.ne.s32.totalorder %s421_s0, %s292_s9  ;;  %p296_p9 = scmp.lt.u32.totalorder %s292_s9, %s421_s0 }
  0x15   :  { %p298_p10 = pnand %p296_p9, %p293_p8 }
  0x17   :  { %301 = shalt.err (!%p298_p10)
}
  0x18   :  { %s302_s14 = scalar_lea.vmem %s19_s21, 32  ;;  %p307_p12 = scmp.lt.s32.totalorder %s19_s21, %s19_s21 }
  0x19   :  { %p303_p11 = scmp.ne.s32.totalorder %s19_s21, %s302_s14  ;;  %p308_p13 = scmp.lt.s32.totalorder %s302_s14, %s302_s14 }
  0x1b   :  { %p309_p0 = por %p308_p13, %p307_p12 }
  0x1d   :  { %p310_p1 = pnand %p309_p0, %p303_p11 }
  0x1f   :  { %313 = shalt.err (!%p310_p1)
}
  0x20   :  { %21 = dma.hbm_to_vmem [thread:$0]  %s421_s0, 32, %s19_s21, [#allocation3]  }
  0x21   :  { %s342_s16 = smov [#allocation6]   ;;  %s314_s20 = scalar_lea.hbm %s424_s3, 1024 }
  0x22   :  { %s39_s17 = sshll.u32 %s342_s16, 4  ;;  %p315_p2 = scmp.ne.s32.totalorder %s424_s3, %s314_s20  ;;  %s40_s17 = int_to_ptr.vmem [resolvable:$true] %s39_s17 }
  0x23   :  { %p318_p3 = scmp.lt.u32.totalorder %s314_s20, %s424_s3 }
  0x25   :  { %p320_p4 = pnand %p318_p3, %p315_p2 }
  0x27   :  { %323 = shalt.err (!%p320_p4)
}
  0x28   :  { %s324_s26 = scalar_lea.vmem %s40_s17, 1024  ;;  %p329_p6 = scmp.lt.s32.totalorder %s40_s17, %s40_s17 }
  0x29   :  { %p325_p5 = scmp.ne.s32.totalorder %s40_s17, %s324_s26  ;;  %p330_p7 = scmp.lt.s32.totalorder %s324_s26, %s324_s26 }
  0x2b   :  { %p331_p8 = por %p330_p7, %p329_p6 }
  0x2d   :  { %p332_p9 = pnand %p331_p8, %p325_p5 }
  0x2f   :  { %335 = shalt.err (!%p332_p9)
}
  0x30   :  { %s343_s0 = smov 256   ;;  %s344_s21 = smov 16  }
  0x31   :  { %45 = dma.hbm_to_vmem [thread:$0]  %s424_s3, 1024, %s40_s17, [#allocation5], %s343_s0, %s343_s0, %s344_s21  }
  0x32   :  { %336 = dma.done.wait [#allocation3], 32  }
  0x33   :  { %337 = vsyncadd [#allocation3], 4294967264 }
  0x34   :  { %338 = dma.done.wait [#allocation5], 1280  }
  0x35   :  { %339 = vsyncadd [#allocation5], 4294966016  ;;  %v345_v0 = vmov 0.0   ;;  %v62_v1 = vld [vmem:[#allocation6 + $0x8] sm:$0xff]  ;;  %v64_v2 = vld [vmem:[#allocation6 + $0x18] sm:$0xff]  ;;  %vm144_vm0 = vcmask 64512   ;;  %v221_v17 = vlaneseq }
  0x36   :  { %212 = vmatprep.mubr.f32.mxu0 %v345_v0  ;;  %137 = vmatprep.mubr.f32.mxu1 %v345_v0  ;;  %v61_v3 = vld [vmem:[#allocation6] sm:$0xff]  ;;  %v254_v4 = vpack.c.bf16 %v64_v2, %v62_v1  ;;  %v63_v5 = vld [vmem:[#allocation6 + $0x10] sm:$0xff]  ;;  %v66_v6 = vld [vmem:[#allocation6 + $0x28] sm:$0xff]  ;;  %vm69_vm1 = vcmask 261120  }
  0x37   :  { %v68_v7 = vld [vmem:[#allocation6 + $0x38] sm:$0xff]  ;;  %v256_v8 = vpack.c.bf16 %v63_v5, %v61_v3  ;;  %v65_v10 = vld [vmem:[#allocation6 + $0x20] sm:$0xff]  ;;  %v67_v11 = vld [vmem:[#allocation6 + $0x30] sm:$0xff]  ;;  %v222_v18 = vshrl.u32 %v221_v17, 7 }
  0x38   :  { %v258_v9 = vpack.c.bf16 %v68_v7, %v66_v6  ;;  %v59_v12 = vld [vmem:[#allocation4 + $0x8] sm:$0xff]  ;;  %255 = vmatprep.subr.bf16.mxu1 %v254_v4  ;;  %v58_v13 = vld [vmem:[#allocation4] sm:$0xff]  ;;  %v57_v14 = vld [vmem:[#allocation2] sm:$0x3]  ;;  %v260_v15 = vpack.c.bf16 %v67_v11, %v65_v10 }
  0x39   :  { %148 = vmatprep.subr.mxu0 %v59_v12  ;;  %257 = vmatpush1.bf16.msra.mxu1 %v256_v8  ;;  %v60_v16 = vld [vmem:[%s422_s1] sm:$0x3]  ;;  %v223_v20 = vsub.s32 0, %v222_v18  ;;  %v227_v23 = vsub.s32 1, %v222_v18 }
  0x3a   :  { %149 = vmatpush1.msra.mxu0 %v58_v13  ;;  %259 = vmatprep.subr.bf16.mxu1 %v258_v9  ;;  %v219_v22 = vld [vmem:[%s425_s4] sm:$0x3] }
  0x3b   :  { %252 = vmatmul.mubr.msk.f32.vlgmr.msra.gmra.mrb[0].mxu0 %vm144_vm0, %v57_v14  ;;  %v224_v24 = vrot.slane %v219_v22, %v223_v20  ;;  %v228_v26 = vrot.slane %v219_v22, %v227_v23 }
  0x3d   :  { %261 = vmatpush1.bf16.msra.mxu1 %v260_v15 }
  0x40   :  { %251 = vmatmul.mubr.msk.f32.vlgmr.msra.gmra.mrb[0].mxu1 %vm69_vm1, %v60_v16 }
 0x10e   :  { %v214_v19 = vpop.f32.mrb[0].mxu0 }
 0x10f   :  { %v216_v21 = vpop.f32.mrb[1].mxu0 }
 0x113   :  { %v139_v25 = vpop.f32.mrb[0].mxu1 }
 0x114   :  { %v215_v27 = vadd.f32 %v214_v19, %v139_v25  ;;  %v141_v28 = vpop.f32.mrb[1].mxu1 }
 0x115   :  { %v217_v29 = vadd.f32 %v216_v21, %v141_v28 }
 0x116   :  { %v231_v30 = vadd.f32 %v224_v24, %v215_v27 }
 0x117   :  { %v232_v31 = vadd.f32 %v228_v26, %v217_v29 }
 0x119   :  { %v235_v32 = vcombine.low %v231_v30, %v232_v31 }
 0x11b   :  { %253 = vst.sshfl [vmem:[%s426_s5] sm:$0x33 pattern:$0x76325410] %v235_v32 }
 0x11c   :  { %249 = vsyncpa [#allocation3], 1 }
 0x11d   :  { %250 = vsyncpa [#allocation5], 1 }

</bundles_post_ra>
